<compile_context>
chip_gen: v7x
topology: tpu7x:2x2x1
jax: 0.10.0
libtpu: 0.0.40
codegen_flags: <defaults>
</compile_context>

<pallas_src>
import math

import jax
import jax.numpy as jnp
from jax.experimental import pallas as pl
from jax.experimental.pallas import tpu as pltpu

_GELU_C = math.sqrt(2.0 / math.pi)


def _ffn_kernel(x_ref, w1_ref, b1_ref, w2_ref, b2_ref, o_ref, acc_ref):
    # x_ref : (TM, Dp)      w1_ref: (Dp, TF)   b1_ref: (1, TF)
    # w2_ref: (TF, Dp)      b2_ref: (1, Dp)    o_ref : (TM, Dp)
    # acc_ref: (TM, Dp) f32 accumulator, resident across the k (d_ff) sweep.
    k = pl.program_id(1)

    @pl.when(k == 0)
    def _():
        acc_ref[...] = jnp.zeros_like(acc_ref)

    # h tile = x @ W1^T[:, k-slice] + b1[k-slice]   (native dtype in, f32 accumulate)
    h = jnp.dot(x_ref[...], w1_ref[...], preferred_element_type=jnp.float32)
    h = h + b1_ref[...].astype(jnp.float32)

    # tanh-approx GELU in f32; reuse h*h, tanh goes to the EUP slot.
    h2 = h * h
    g = 0.5 * h * (1.0 + jnp.tanh(_GELU_C * (h + 0.044715 * h * h2)))

    # TODO(synk): training-mode dropout (p=0.1) would need pltpu.prng_seed /
    # prng_random_bits masking; forward here follows eval semantics (identity).

    # Accumulate partial (TM, TF) @ W2^T[k-slice, :] into the f32 accumulator.
    acc_ref[...] += jnp.dot(g.astype(w2_ref.dtype), w2_ref[...],
                            preferred_element_type=jnp.float32)

    @pl.when(k == pl.num_programs(1) - 1)
    def _():
        o_ref[...] = (acc_ref[...] + b2_ref[...].astype(jnp.float32)).astype(o_ref.dtype)


def _round_up(a, b):
    return (a + b - 1) // b * b


def positionwise_feed_forward(x, w1, b1, w2, b2, *, tile_m=256, tile_f=512):
    """x: (B, S, d_model); w1: (d_ff, d_model); b1: (d_ff,); w2: (d_model, d_ff); b2: (d_model,)."""
    B, S, d_model = x.shape
    d_ff = w1.shape[0]
    N = B * S

    # Lane-dense padding: feature dims padded to multiples of 128. Zero padding
    # is exact — padded hidden columns give h == 0 and GELU(0) == 0, padded
    # output columns / rows are sliced off at the end.
    dm_p = _round_up(d_model, 128)
    tf = min(tile_f, _round_up(d_ff, 128))
    df_p = _round_up(d_ff, tf)
    tm = min(tile_m, _round_up(N, 8))
    n_p = _round_up(N, tm)

    dtype = x.dtype
    x2 = jnp.zeros((n_p, dm_p), dtype).at[:N, :d_model].set(x.reshape(N, d_model))
    w1_t = jnp.zeros((dm_p, df_p), w1.dtype).at[:d_model, :d_ff].set(w1.T)
    w2_t = jnp.zeros((df_p, dm_p), w2.dtype).at[:d_ff, :d_model].set(w2.T)
    b1_2 = jnp.zeros((1, df_p), b1.dtype).at[0, :d_ff].set(b1)
    b2_2 = jnp.zeros((1, dm_p), b2.dtype).at[0, :d_model].set(b2)

    grid = (n_p // tm, df_p // tf)  # (rows, hidden) — reduction axis last

    itemsize = jnp.dtype(dtype).itemsize
    cost = pl.CostEstimate(
        flops=4 * n_p * dm_p * df_p,                 # two matmuls
        transcendentals=n_p * df_p,                  # tanh per hidden element
        bytes_accessed=(x2.size + w1_t.size + w2_t.size + n_p * dm_p) * itemsize,
    )

    out = pl.pallas_call(
        _ffn_kernel,
        out_shape=jax.ShapeDtypeStruct((n_p, dm_p), dtype),
        grid_spec=pltpu.PrefetchScalarGridSpec(
            num_scalar_prefetch=0,
            grid=grid,
            in_specs=[
                pl.BlockSpec((tm, dm_p), lambda i, k: (i, 0)),   # x rows (resident over k)
                pl.BlockSpec((dm_p, tf), lambda i, k: (0, k)),   # W1^T hidden slice (streamed)
                pl.BlockSpec((1, tf), lambda i, k: (0, k)),      # b1 slice
                pl.BlockSpec((tf, dm_p), lambda i, k: (k, 0)),   # W2^T hidden slice (streamed)
                pl.BlockSpec((1, dm_p), lambda i, k: (0, 0)),    # b2
            ],
            out_specs=pl.BlockSpec((tm, dm_p), lambda i, k: (i, 0)),
            scratch_shapes=[pltpu.VMEM((tm, dm_p), jnp.float32)],
        ),
        compiler_params=pltpu.CompilerParams(
            dimension_semantics=("parallel", "arbitrary"),
            vmem_limit_bytes=64 * 1024 * 1024,
        ),
        cost_estimate=cost,
    )(x2, w1_t, b1_2, w2_t, b2_2)

    return out[:N, :d_model].reshape(B, S, d_model)


def _reference(x, w1, b1, w2, b2):
    h = jnp.einsum("bsd,fd->bsf", x, w1) + b1
    g = 0.5 * h * (1.0 + jnp.tanh(_GELU_C * (h + 0.044715 * h ** 3)))
    return jnp.einsum("bsf,df->bsd", g, w2) + b2


if __name__ == "__main__":
    key = jax.random.PRNGKey(0)
    B, S, d_model, d_ff = 2, 8, 32, 64

    kx, k1, kb1, k2, kb2 = jax.random.split(key, 5)
    x = jax.random.normal(kx, (B, S, d_model), dtype=jnp.float32)

    # Deterministic init mimicking nn.Linear's uniform(-1/sqrt(fan_in), 1/sqrt(fan_in))
    bound1 = 1.0 / math.sqrt(d_model)
    w1 = jax.random.uniform(k1, (d_ff, d_model), jnp.float32, -bound1, bound1)
    b1 = jax.random.uniform(kb1, (d_ff,), jnp.float32, -bound1, bound1)
    bound2 = 1.0 / math.sqrt(d_ff)
    w2 = jax.random.uniform(k2, (d_model, d_ff), jnp.float32, -bound2, bound2)
    b2 = jax.random.uniform(kb2, (d_model,), jnp.float32, -bound2, bound2)

    y = positionwise_feed_forward(x, w1, b1, w2, b2)
    y = jax.block_until_ready(y)

    y_ref = _reference(x, w1, b1, w2, b2)
    assert y.shape == (B, S, d_model)
    assert jnp.allclose(y, y_ref, atol=1e-5, rtol=1e-5)

    print("KERNEL_OK")
</pallas_src>

<mosaic_0001>
module attributes {stable_mosaic.version = 11 : i64} {
  func.func @_ffn_kernel(%arg0: i32, %arg1: i32, %arg2: memref<16x128xf32, #tpu.memory_space<vmem>>, %arg3: memref<128x128xf32, #tpu.memory_space<vmem>>, %arg4: memref<1x128xf32, #tpu.memory_space<vmem>>, %arg5: memref<128x128xf32, #tpu.memory_space<vmem>>, %arg6: memref<1x128xf32, #tpu.memory_space<vmem>>, %arg7: memref<16x128xf32, #tpu.memory_space<vmem>>, %arg8: memref<16x128xf32, #tpu.memory_space<vmem>>) attributes {dimension_semantics = [#tpu.dimension_semantics<parallel>, #tpu.dimension_semantics<arbitrary>], iteration_bounds = array<i64: 1, 1>, scalar_prefetch = 0 : i64, scratch_operands = 1 : i64, tpu.core_type = #tpu.core_type<tc>, window_params = [{transform_indices = @transform_0, window_bounds = array<i64: 16, 128>}, {transform_indices = @transform_1, window_bounds = array<i64: 128, 128>}, {transform_indices = @transform_2, window_bounds = array<i64: 1, 128>}, {transform_indices = @transform_3, window_bounds = array<i64: 128, 128>}, {pipeline_mode = #tpu.pipeline_mode<synchronous>, transform_indices = @transform_4, window_bounds = array<i64: 1, 128>}, {transform_indices = @transform_5, window_bounds = array<i64: 16, 128>}]} {
    %c0_i32 = arith.constant 0 : i32
    %0 = arith.cmpi eq, %arg1, %c0_i32 : i32
    %1 = arith.extui %0 : i1 to i32
    %c0_i32_0 = arith.constant 0 : i32
    %2 = arith.cmpi ne, %1, %c0_i32_0 : i32
    scf.if %2 {
      %cst_19 = arith.constant 0.000000e+00 : f32
      %30 = vector.broadcast %cst_19 : f32 to vector<16x128xf32>
      %c0_20 = arith.constant 0 : index
      %c0_21 = arith.constant 0 : index
      %31 = vector.load %arg8[%c0_20, %c0_21] : memref<16x128xf32, #tpu.memory_space<vmem>>, vector<16x128xf32>
      tpu.vector_store %arg8[%c0_20, %c0_21], %30 {strides = array<i32>} : memref<16x128xf32, #tpu.memory_space<vmem>>, vector<16x128xf32>,
    } else {
    }
    %c0 = arith.constant 0 : index
    %c0_1 = arith.constant 0 : index
    %3 = vector.load %arg2[%c0, %c0_1] : memref<16x128xf32, #tpu.memory_space<vmem>>, vector<16x128xf32>
    %c0_2 = arith.constant 0 : index
    %c0_3 = arith.constant 0 : index
    %4 = vector.load %arg3[%c0_2, %c0_3] : memref<128x128xf32, #tpu.memory_space<vmem>>, vector<128x128xf32>
    %cst = arith.constant dense<0.000000e+00> : vector<16x128xf32>
    %5 = tpu.matmul %3, %4, %cst {dimension_numbers = #tpu.dot_dimension_numbers<[1], [0], [0], [1], [0, 0, 1, 1], [], []>} : vector<16x128xf32>, vector<128x128xf32>, vector<16x128xf32> -> vector<16x128xf32>
    %c0_4 = arith.constant 0 : index
    %c0_5 = arith.constant 0 : index
    %6 = vector.load %arg4[%c0_4, %c0_5] : memref<1x128xf32, #tpu.memory_space<vmem>>, vector<1x128xf32>
    %7 = vector.broadcast %6 : vector<1x128xf32> to vector<16x128xf32>
    %8 = arith.addf %5, %7 : vector<16x128xf32>
    %9 = arith.mulf %8, %8 : vector<16x128xf32>
    %cst_6 = arith.constant 5.000000e-01 : f32
    %10 = vector.broadcast %cst_6 : f32 to vector<16x128xf32>
    %11 = arith.mulf %10, %8 : vector<16x128xf32>
    %cst_7 = arith.constant 4.471500e-02 : f32
    %12 = vector.broadcast %cst_7 : f32 to vector<16x128xf32>
    %13 = arith.mulf %12, %8 : vector<16x128xf32>
    %14 = arith.mulf %13, %9 : vector<16x128xf32>
    %15 = arith.addf %8, %14 : vector<16x128xf32>
    %cst_8 = arith.constant 0.797884583 : f32
    %16 = vector.broadcast %cst_8 : f32 to vector<16x128xf32>
    %17 = arith.mulf %16, %15 : vector<16x128xf32>
    %18 = math.tanh %17 : vector<16x128xf32>
    %cst_9 = arith.constant 1.000000e+00 : f32
    %19 = vector.broadcast %cst_9 : f32 to vector<16x128xf32>
    %20 = arith.addf %19, %18 : vector<16x128xf32>
    %21 = arith.mulf %11, %20 : vector<16x128xf32>
    %c0_10 = arith.constant 0 : index
    %c0_11 = arith.constant 0 : index
    %22 = vector.load %arg8[%c0_10, %c0_11] : memref<16x128xf32, #tpu.memory_space<vmem>>, vector<16x128xf32>
    %c0_12 = arith.constant 0 : index
    %c0_13 = arith.constant 0 : index
    %23 = vector.load %arg5[%c0_12, %c0_13] : memref<128x128xf32, #tpu.memory_space<vmem>>, vector<128x128xf32>
    %cst_14 = arith.constant dense<0.000000e+00> : vector<16x128xf32>
    %24 = tpu.matmul %21, %23, %cst_14 {dimension_numbers = #tpu.dot_dimension_numbers<[1], [0], [0], [1], [0, 0, 1, 1], [], []>} : vector<16x128xf32>, vector<128x128xf32>, vector<16x128xf32> -> vector<16x128xf32>
    %25 = arith.addf %22, %24 : vector<16x128xf32>
    %c0_15 = arith.constant 0 : index
    %c0_16 = arith.constant 0 : index
    %26 = vector.load %arg8[%c0_15, %c0_16] : memref<16x128xf32, #tpu.memory_space<vmem>>, vector<16x128xf32>
    tpu.vector_store %arg8[%c0_15, %c0_16], %25 {strides = array<i32>} : memref<16x128xf32, #tpu.memory_space<vmem>>, vector<16x128xf32>,
    %c0_i32_17 = arith.constant 0 : i32
    %27 = arith.cmpi eq, %arg1, %c0_i32_17 : i32
    %28 = arith.extui %27 : i1 to i32
    %c0_i32_18 = arith.constant 0 : i32
    %29 = arith.cmpi ne, %28, %c0_i32_18 : i32
    scf.if %29 {
      %c0_19 = arith.constant 0 : index
      %c0_20 = arith.constant 0 : index
      %30 = vector.load %arg8[%c0_19, %c0_20] : memref<16x128xf32, #tpu.memory_space<vmem>>, vector<16x128xf32>
      %c0_21 = arith.constant 0 : index
      %c0_22 = arith.constant 0 : index
      %31 = vector.load %arg6[%c0_21, %c0_22] : memref<1x128xf32, #tpu.memory_space<vmem>>, vector<1x128xf32>
      %32 = vector.broadcast %31 : vector<1x128xf32> to vector<16x128xf32>
      %33 = arith.addf %30, %32 : vector<16x128xf32>
      %c0_23 = arith.constant 0 : index
      %c0_24 = arith.constant 0 : index
      %34 = vector.load %arg7[%c0_23, %c0_24] : memref<16x128xf32, #tpu.memory_space<vmem>>, vector<16x128xf32>
      tpu.vector_store %arg7[%c0_23, %c0_24], %33 {strides = array<i32>} : memref<16x128xf32, #tpu.memory_space<vmem>>, vector<16x128xf32>,
    } else {
    }
    return
  }
  func.func @transform_0(%arg0: i32, %arg1: i32) -> (i32, i32) {
    %c0_i32 = arith.constant 0 : i32
    %c0_i32_0 = arith.constant 0 : i32
    return %arg0, %c0_i32 : i32, i32
  }
  func.func @transform_1(%arg0: i32, %arg1: i32) -> (i32, i32) {
    %c0_i32 = arith.constant 0 : i32
    %c0_i32_0 = arith.constant 0 : i32
    return %c0_i32, %arg1 : i32, i32
  }
  func.func @transform_2(%arg0: i32, %arg1: i32) -> (i32, i32) {
    %c0_i32 = arith.constant 0 : i32
    %c0_i32_0 = arith.constant 0 : i32
    return %c0_i32, %arg1 : i32, i32
  }
  func.func @transform_3(%arg0: i32, %arg1: i32) -> (i32, i32) {
    %c0_i32 = arith.constant 0 : i32
    %c0_i32_0 = arith.constant 0 : i32
    return %arg1, %c0_i32 : i32, i32
  }
  func.func @transform_4(%arg0: i32, %arg1: i32) -> (i32, i32) {
    %c0_i32 = arith.constant 0 : i32
    %c0_i32_0 = arith.constant 0 : i32
    %c0_i32_1 = arith.constant 0 : i32
    return %c0_i32, %c0_i32_0 : i32, i32
  }
  func.func @transform_5(%arg0: i32, %arg1: i32) -> (i32, i32) {
    %c0_i32 = arith.constant 0 : i32
    %c0_i32_0 = arith.constant 0 : i32
    return %arg0, %c0_i32 : i32, i32
  }
}

</mosaic_0001>

<bundles_post_ra>
// kernel: tpu_custom_call.1
= control target key start
LH: loop header
LB: loop body
LE: loop exit
PB: predicated region body
PF: predicated region fallthrough
CT: control target
= control target key end

     0   :  { %10 = vsyncpa [#allocation4], 0  ;;  %s794_s0 = inlined_call_operand.hbm [shape: f32[16,128], index: 0, kind: input, shape index: {}]   ;;  %s795_s1 = inlined_call_operand.hbm [shape: f32[128,128], index: 1, kind: input, shape index: {}]   ;;  %s796_s2 = inlined_call_operand.hbm [shape: f32[1,128], index: 2, kind: input, shape index: {}]   ;;  %s797_s3 = inlined_call_operand.hbm [shape: f32[128,128], index: 3, kind: input, shape index: {}]   ;;  %s798_s4 = inlined_call_operand.hbm [shape: f32[1,128], index: 4, kind: input, shape index: {}]   ;;  %s799_s5 = inlined_call_operand.hbm [shape: f32[16,128], index: 5, kind: output, shape index: {}]  }
   0x1   :  { %11 = vsyncpa [#allocation7], 0 }
   0x2   :  { %12 = vsyncpa [#allocation10], 0 }
   0x3   :  { %13 = vsyncpa [#allocation5], 0  ;;  %s665_s18 = smov [#allocation6]   ;;  %s666_s20 = smov [#allocation9]  }
   0x4   :  { %s31_s19 = sshll.u32 %s665_s18, 4  ;;  %s53_s21 = sshll.u32 %s666_s20, 4  ;;  %s32_s19 = int_to_ptr.vmem [resolvable:$true] %s31_s19  ;;  %s703_s21 = int_to_ptr.vmem [resolvable:$true] %s53_s21 }
   0x5   :  { %s525_s24 = scalar_lea.hbm %s795_s1, 2048 }
   0x6   :  { %p526_p0 = scmp.ne.s32.totalorder %s795_s1, %s525_s24  ;;  %p529_p1 = scmp.lt.u32.totalorder %s525_s24, %s795_s1 }
   0x8   :  { %p531_p2 = pnand %p529_p1, %p526_p0 }
   0xa   :  { %534 = shalt.err (!%p531_p2)
}
   0xb   :  { %s535_s29 = scalar_lea.vmem %s32_s19, 2048  ;;  %p540_p4 = scmp.lt.s32.totalorder %s32_s19, %s32_s19 }
   0xc   :  { %p536_p3 = scmp.ne.s32.totalorder %s32_s19, %s535_s29  ;;  %p541_p5 = scmp.lt.s32.totalorder %s535_s29, %s535_s29 }
   0xe   :  { %p542_p6 = por %p541_p5, %p540_p4 }
  0x10   :  { %p543_p7 = pnand %p542_p6, %p536_p3 }
  0x12   :  { %546 = shalt.err (!%p543_p7)
}
  0x13   :  { %s667_s30 = smov 128   ;;  %s668_s6 = smov 8  }
  0x14   :  { %37 = dma.hbm_to_vmem [thread:$0]  %s795_s1, 2048, %s32_s19, [#allocation7], %s667_s30, %s667_s30, %s668_s6  }
  0x15   :  { %s547_s11 = scalar_lea.hbm %s797_s3, 2048 }
  0x16   :  { %p548_p8 = scmp.ne.s32.totalorder %s797_s3, %s547_s11  ;;  %p551_p9 = scmp.lt.u32.totalorder %s547_s11, %s797_s3 }
  0x18   :  { %p553_p10 = pnand %p551_p9, %p548_p8 }
  0x1a   :  { %556 = shalt.err (!%p553_p10)
}
  0x1b   :  { %s557_s16 = scalar_lea.vmem %s703_s21, 2048  ;;  %p562_p12 = scmp.lt.s32.totalorder %s703_s21, %s703_s21 }
  0x1c   :  { %p558_p11 = scmp.ne.s32.totalorder %s703_s21, %s557_s16  ;;  %p563_p13 = scmp.lt.s32.totalorder %s557_s16, %s557_s16 }
  0x1e   :  { %p564_p0 = por %p563_p13, %p562_p12 }
  0x20   :  { %p565_p1 = pnand %p564_p0, %p558_p11 }
  0x22   :  { %568 = shalt.err (!%p565_p1)
}
  0x23   :  { %59 = dma.hbm_to_vmem [thread:$0]  %s797_s3, 2048, %s703_s21, [#allocation10], %s667_s30, %s667_s30, %s668_s6  }
  0x24   :  { %s669_s18 = smov [#allocation3]   ;;  %s670_s20 = smov [#allocation8]  }
  0x25   :  { %s19_s19 = sshll.u32 %s669_s18, 4  ;;  %s44_s22 = sshll.u32 %s670_s20, 4  ;;  %s20_s19 = int_to_ptr.vmem [resolvable:$true] %s19_s19  ;;  %s45_s22 = int_to_ptr.vmem [resolvable:$true] %s44_s22 }
  0x26   :  { %s569_s25 = scalar_lea.hbm %s794_s0, 256 }
  0x27   :  { %p570_p2 = scmp.ne.s32.totalorder %s794_s0, %s569_s25  ;;  %p573_p3 = scmp.lt.u32.totalorder %s569_s25, %s794_s0 }
  0x29   :  { %p575_p4 = pnand %p573_p3, %p570_p2 }
  0x2b   :  { %578 = shalt.err (!%p575_p4)
}
  0x2c   :  { %s579_s3 = scalar_lea.vmem %s20_s19, 256  ;;  %p584_p6 = scmp.lt.s32.totalorder %s20_s19, %s20_s19 }
  0x2d   :  { %p580_p5 = scmp.ne.s32.totalorder %s20_s19, %s579_s3  ;;  %p585_p7 = scmp.lt.s32.totalorder %s579_s3, %s579_s3 }
  0x2f   :  { %p586_p8 = por %p585_p7, %p584_p6 }
  0x31   :  { %p587_p9 = pnand %p586_p8, %p580_p5 }
  0x33   :  { %590 = shalt.err (!%p587_p9)
}
  0x34   :  { %25 = dma.hbm_to_vmem [thread:$0]  %s794_s0, 256, %s20_s19, [#allocation4], %s667_s30, %s667_s30, %s668_s6  }
  0x35   :  { %s591_s10 = scalar_lea.hbm %s796_s2, 16 }
  0x36   :  { %p592_p10 = scmp.ne.s32.totalorder %s796_s2, %s591_s10  ;;  %p595_p11 = scmp.lt.u32.totalorder %s591_s10, %s796_s2 }
  0x38   :  { %p597_p12 = pnand %p595_p11, %p592_p10 }
  0x3a   :  { %600 = shalt.err (!%p597_p12)
}
  0x3b   :  { %s601_s15 = scalar_lea.vmem %s45_s22, 16  ;;  %s605_s16 = scalar_lea.vmem %s45_s22, 32 }
  0x3c   :  { %p602_p13 = scmp.ne.s32.totalorder %s45_s22, %s601_s15  ;;  %p606_p0 = scmp.lt.s32.totalorder %s45_s22, %s45_s22 }
  0x3d   :  { %p607_p1 = scmp.lt.s32.totalorder %s605_s16, %s601_s15 }
  0x3f   :  { %p608_p2 = por %p607_p1, %p606_p0 }
  0x41   :  { %p609_p3 = pnand %p608_p2, %p602_p13 }
  0x43   :  { %612 = shalt.err (!%p609_p3)
}
  0x44   :  { %47 = dma.hbm_to_vmem [thread:$0]  %s796_s2, 16, %s45_s22, [#allocation7]  }
  0x45   :  { %s671_s17 = smov [#allocation11]   ;;  %s613_s23 = scalar_lea.hbm %s798_s4, 16 }
  0x46   :  { %s66_s18 = sshll.u32 %s671_s17, 4  ;;  %p614_p4 = scmp.ne.s32.totalorder %s798_s4, %s613_s23  ;;  %s67_s18 = int_to_ptr.vmem [resolvable:$true] %s66_s18 }
  0x47   :  { %p617_p5 = scmp.lt.u32.totalorder %s613_s23, %s798_s4 }
  0x49   :  { %p619_p6 = pnand %p617_p5, %p614_p4 }
  0x4b   :  { %622 = shalt.err (!%p619_p6)
}
  0x4c   :  { %s623_s28 = scalar_lea.vmem %s67_s18, 16  ;;  %s627_s2 = scalar_lea.vmem %s67_s18, 32 }
  0x4d   :  { %p624_p7 = scmp.ne.s32.totalorder %s67_s18, %s623_s28  ;;  %p628_p8 = scmp.lt.s32.totalorder %s67_s18, %s67_s18 }
  0x4e   :  { %p629_p9 = scmp.lt.s32.totalorder %s627_s2, %s623_s28 }
  0x50   :  { %p630_p10 = por %p629_p9, %p628_p8 }
  0x52   :  { %p631_p11 = pnand %p630_p10, %p624_p7 }
  0x54   :  { %634 = shalt.err (!%p631_p11)
}
  0x55   :  { %69 = dma.hbm_to_vmem [thread:$0]  %s798_s4, 16, %s67_s18, [#allocation10]  }
  0x56   :  { %657 = dma.done.wait [#allocation4], 256  }
  0x57   :  { %658 = vsyncadd [#allocation4], 4294967040 }
  0x58   :  { %659 = dma.done.wait [#allocation7], 2064  }
  0x59   :  { %660 = vsyncadd [#allocation7], 4294965232 }
  0x5a   :  { %661 = dma.done.wait [#allocation10], 2064  }
  0x5b   :  { %662 = vsyncadd [#allocation10], 4294965232  ;;  %v93_v0 = vld [vmem:[#allocation6] sm:$0xff]  ;;  %v94_v1 = vld [vmem:[#allocation6 + $0x8] sm:$0xff]  ;;  %s672_s4 = smov [#allocation12]  }
  0x5c   :  { %v95_v2 = vld [vmem:[#allocation6 + $0x10] sm:$0xff]  ;;  %v449_v3 = vpack.c.bf16 %v94_v1, %v93_v0  ;;  %v96_v4 = vld [vmem:[#allocation6 + $0x18] sm:$0xff]  ;;  %v97_v6 = vld [vmem:[#allocation6 + $0x20] sm:$0xff]  ;;  %s327_s3 = sshll.u32 %s672_s4, 4  ;;  %s328_s3 = int_to_ptr.vmem [resolvable:$true] %s327_s3 }
  0x5d   :  { %v453_v5 = vpack.c.bf16 %v96_v4, %v95_v2  ;;  %v98_v7 = vld [vmem:[#allocation6 + $0x28] sm:$0xff]  ;;  %v99_v9 = vld [vmem:[#allocation6 + $0x30] sm:$0xff]  ;;  %v100_v11 = vld [vmem:[#allocation6 + $0x38] sm:$0xff]  ;;  %s635_s21 = scalar_lea.vmem %s328_s3, 256  ;;  %p640_p13 = scmp.lt.s32.totalorder %s328_s3, %s328_s3 }
  0x5e   :  { %450 = vmatprep.subr.bf16.mxu0 %v449_v3  ;;  %v457_v8 = vpack.c.bf16 %v98_v7, %v97_v6  ;;  %v91_v10 = vld [vmem:[#allocation3] sm:$0xff]  ;;  %v211_v12 = vld [vmem:[#allocation9] sm:$0xff]  ;;  %v461_v15 = vpack.c.bf16 %v100_v11, %v99_v9  ;;  %v104_v20 = vld [vmem:[#allocation6 + $0x58] sm:$0xff]  ;;  %p636_p12 = scmp.ne.s32.totalorder %s328_s3, %s635_s21  ;;  %p641_p0 = scmp.lt.s32.totalorder %s635_s21, %s635_s21 }
  0x5f   :  { %452 = vmatpush3.bf16.msra.mxu0 %v449_v3  ;;  %411 = vmatprep.mubr.f32.mxu0 %v91_v10  ;;  %v212_v13 = vld [vmem:[#allocation9 + $0x8] sm:$0xff]  ;;  %v101_v16 = vld [vmem:[#allocation6 + $0x40] sm:$0xff]  ;;  %v108_v26 = vld [vmem:[#allocation6 + $0x78] sm:$0xff] }
  0x60   :  { %454 = vmatprep.subr.bf16.mxu0 %v453_v5  ;;  %v481_v14 = vpack.c.bf16 %v212_v13, %v211_v12  ;;  %v102_v17 = vld [vmem:[#allocation6 + $0x48] sm:$0xff]  ;;  %v103_v19 = vld [vmem:[#allocation6 + $0x50] sm:$0xff]  ;;  %v105_v22 = vld [vmem:[#allocation6 + $0x60] sm:$0xff]  ;;  %p642_p1 = por %p641_p0, %p640_p13 }
  0x61   :  { %v465_v18 = vpack.c.bf16 %v102_v17, %v101_v16  ;;  %v469_v21 = vpack.c.bf16 %v104_v20, %v103_v19  ;;  %v106_v23 = vld [vmem:[#allocation6 + $0x68] sm:$0xff]  ;;  %v107_v25 = vld [vmem:[#allocation6 + $0x70] sm:$0xff]  ;;  %v92_v28 = vld [vmem:[#allocation3 + $0x8] sm:$0xff] }
  0x62   :  { %482 = vmatprep.subr.bf16.mxu1 %v481_v14  ;;  %v473_v24 = vpack.c.bf16 %v106_v23, %v105_v22  ;;  %v477_v27 = vpack.c.bf16 %v108_v26, %v107_v25  ;;  %v213_v29 = vld [vmem:[#allocation9 + $0x10] sm:$0xff]  ;;  %v214_v30 = vld [vmem:[#allocation9 + $0x18] sm:$0xff]  ;;  %v215_v32 = vld [vmem:[#allocation9 + $0x20] sm:$0xff]  ;;  %p643_p2 = pnand %p642_p1, %p636_p12 }
  0x63   :  { %456 = vmatpush3.bf16.msra.mxu0 %v453_v5  ;;  %484 = vmatpush3.bf16.msra.mxu1 %v481_v14  ;;  %v485_v31 = vpack.c.bf16 %v214_v30, %v213_v29  ;;  %v216_v33 = vld [vmem:[#allocation9 + $0x28] sm:$0xff]  ;;  %v217_v35 = vld [vmem:[#allocation9 + $0x30] sm:$0xff]  ;;  %v218_v36 = vld [vmem:[#allocation9 + $0x38] sm:$0xff] }
  0x64   :  { %458 = vmatprep.subr.bf16.mxu0 %v457_v8  ;;  %v489_v34 = vpack.c.bf16 %v216_v33, %v215_v32  ;;  %v493_v37 = vpack.c.bf16 %v218_v36, %v217_v35  ;;  %v219_v38 = vld [vmem:[#allocation9 + $0x40] sm:$0xff]  ;;  %v220_v39 = vld [vmem:[#allocation9 + $0x48] sm:$0xff]  ;;  %v221_v40 = vld [vmem:[#allocation9 + $0x50] sm:$0xff] }
  0x65   :  { %486 = vmatprep.subr.bf16.mxu1 %v485_v31  ;;  %v497_v41 = vpack.c.bf16 %v220_v39, %v219_v38  ;;  %v222_v42 = vld [vmem:[#allocation9 + $0x58] sm:$0xff]  ;;  %v223_v44 = vld [vmem:[#allocation9 + $0x60] sm:$0xff]  ;;  %v224_v45 = vld [vmem:[#allocation9 + $0x68] sm:$0xff] }
  0x66   :  { %v501_v43 = vpack.c.bf16 %v222_v42, %v221_v40  ;;  %v505_v46 = vpack.c.bf16 %v224_v45, %v223_v44  ;;  %v225_v47 = vld [vmem:[#allocation9 + $0x70] sm:$0xff]  ;;  %v226_v48 = vld [vmem:[#allocation9 + $0x78] sm:$0xff]  ;;  %v342_v9 = vld [vmem:[#allocation11] ss:$0 sm:$0xff] }
  0x67   :  { %460 = vmatpush3.bf16.msra.mxu0 %v457_v8  ;;  %488 = vmatpush3.bf16.msra.mxu1 %v485_v31  ;;  %v509_v49 = vpack.c.bf16 %v226_v48, %v225_v47  ;;  %v341_v50 = vld [vmem:[#allocation8] ss:$0 sm:$0xff] }
  0x68   :  { %462 = vmatprep.subr.bf16.mxu0 %v461_v15  ;;  %490 = vmatprep.subr.bf16.mxu1 %v489_v34 }
  0x6b   :  { %464 = vmatpush3.bf16.msra.mxu0 %v461_v15  ;;  %492 = vmatpush3.bf16.msra.mxu1 %v489_v34 }
  0x6c   :  { %466 = vmatprep.subr.bf16.mxu0 %v465_v18  ;;  %494 = vmatprep.subr.bf16.mxu1 %v493_v37 }
  0x6f   :  { %468 = vmatpush3.bf16.msra.mxu0 %v465_v18  ;;  %496 = vmatpush3.bf16.msra.mxu1 %v493_v37 }
  0x70   :  { %470 = vmatprep.subr.bf16.mxu0 %v469_v21  ;;  %498 = vmatprep.subr.bf16.mxu1 %v497_v41 }
  0x73   :  { %472 = vmatpush3.bf16.msra.mxu0 %v469_v21  ;;  %500 = vmatpush3.bf16.msra.mxu1 %v497_v41 }
  0x74   :  { %474 = vmatprep.subr.bf16.mxu0 %v473_v24  ;;  %502 = vmatprep.subr.bf16.mxu1 %v501_v43 }
  0x77   :  { %476 = vmatpush3.bf16.msra.mxu0 %v473_v24  ;;  %504 = vmatpush3.bf16.msra.mxu1 %v501_v43 }
  0x78   :  { %478 = vmatprep.subr.bf16.mxu0 %v477_v27  ;;  %506 = vmatprep.subr.bf16.mxu1 %v505_v46 }
  0x7b   :  { %480 = vmatpush3.bf16.msra.mxu0 %v477_v27  ;;  %508 = vmatpush3.bf16.msra.mxu1 %v505_v46 }
  0x7c   :  { %510 = vmatprep.subr.bf16.mxu1 %v509_v49 }
  0x7e   :  { %412 = vmatmul.mubr.f32.vlgmr.msra.gmra.mrb[0].mxu0 %v92_v28 }
  0x7f   :  { %512 = vmatpush3.bf16.msra.mxu1 %v509_v49 }
 0x151   :  { %v413_v51 = vpop.f32.mrb[0].mxu0 }
 0x152   :  { %v188_v52 = vadd.f32 %v413_v51, %v341_v50  ;;  %v182_v53 = vpop.f32.mrb[1].mxu0 }
 0x153   :  { %v183_v54 = vadd.f32 %v341_v50, %v182_v53 }
 0x154   :  { %v192_v55 = vmul.f32 %v188_v52, %v188_v52  ;;  %v196_v56 = vmul.f32 0.044715, %v188_v52  ;;  %v194_v6 = vmul.f32 0.5, %v188_v52 }
 0x155   :  { %v191_v57 = vmul.f32 %v183_v54, %v183_v54  ;;  %v195_v58 = vmul.f32 0.044715, %v183_v54  ;;  %v193_v4 = vmul.f32 0.5, %v183_v54 }
 0x156   :  { %v198_v59 = vmul.f32 %v196_v56, %v192_v55 }
 0x157   :  { %v197_v60 = vmul.f32 %v195_v58, %v191_v57 }
 0x158   :  { %v200_v61 = vadd.f32 %v198_v59, %v188_v52 }
 0x159   :  { %v199_v62 = vadd.f32 %v197_v60, %v183_v54 }
 0x15a   :  { %v202_v63 = vmul.f32 0.7978846, %v200_v61 }
 0x15b   :  { %v201_v0 = vmul.f32 0.7978846, %v199_v62 }
 0x15c   :  { %521 = vtanh.f32 %v202_v63 }
 0x15d   :  { %523 = vtanh.f32 %v201_v0 }
 0x166   :  { %v522_v1 = vpop.eup %521 }
 0x167   :  { %v524_v2 = vpop.eup %523  ;;  %v206_v3 = vadd.f32 1.0, %v522_v1 }
 0x168   :  { %v205_v5 = vadd.f32 1.0, %v524_v2 }
 0x169   :  { %v208_v8 = vmul.f32 %v206_v3, %v194_v6 }
 0x16a   :  { %v207_v7 = vmul.f32 %v205_v5, %v193_v4 }
 0x16c   :  { %446 = vmatprep.mubr.f32.mxu1 %v207_v7 }
 0x16d   :  { %447 = vmatmul.mubr.f32.vlgmr.msra.gmra.mrb[0].mxu1 %v208_v8 }
 0x240   :  { %v448_v10 = vpop.f32.mrb[0].mxu1 }
 0x241   :  { %v319_v11 = vadd.f32 %v448_v10, %v342_v9  ;;  %v293_v12 = vpop.f32.mrb[1].mxu1 }
 0x242   :  { %v318_v13 = vadd.f32 %v342_v9, %v293_v12 }
 0x243   :  { %321 = vst [vmem:[#allocation12 + $0x8] sm:$0xff] %v319_v11 }
 0x244   :  { %320 = vst [vmem:[#allocation12] sm:$0xff] %v318_v13 }
 0x245   :  { %646 = shalt.err (!%p643_p2)
}
 0x246   :  { %s647_s9 = scalar_lea.hbm %s799_s5, 256 }
 0x247   :  { %p648_p3 = scmp.ne.s32.totalorder %s799_s5, %s647_s9  ;;  %p651_p4 = scmp.lt.u32.totalorder %s647_s9, %s799_s5 }
 0x249   :  { %p653_p5 = pnand %p651_p4, %p648_p3 }
 0x24b   :  { %656 = shalt.err (!%p653_p5)
}
 0x24c   :  { %333 = dma.vmem_to_hbm [thread:$0]  %s328_s3, 256, %s799_s5, [#allocation5], %s667_s30, %s667_s30, %s668_s6  }
 0x24d   :  { %663 = dma.done.wait [#allocation5], 256  }
 0x24e   :  { %664 = vsyncadd [#allocation5], 4294967040 }
 0x24f   :  { %337 = vsyncpa [#allocation4], 1 }
 0x250   :  { %338 = vsyncpa [#allocation7], 1 }
 0x251   :  { %339 = vsyncpa [#allocation10], 1 }
 0x252   :  { %340 = vsyncpa [#allocation5], 1 }

</bundles_post_ra>
